<compile_context>
chip_gen: v5e
topology: v5e:2x2
jax: 0.10.0
libtpu: 0.0.40
codegen_flags: <defaults>
</compile_context>

<pallas_src>
import jax
import jax.numpy as jnp
from jax.experimental import pallas as pl
from jax.experimental.pallas import tpu as pltpu


# ----------------------------------------------------------------------------
# Fused kernel (one batch tile per grid step)
# ----------------------------------------------------------------------------
def attentive_stats_pooling_kernel(x_ref, w1_ref, bw_ref, out_ref, attw_ref):
    """Fused AttentiveStatsPooling forward for one batch tile.

    x_ref    : (tB, T, D)  input tile, feature dim on the 128-lane axis
    w1_ref   : (D, A)      first attention Linear weight, (in, out) layout
    bw_ref   : (2, A)      packed params: row 0 = b1 + gcv @ W1, row 1 = w2 row
    out_ref  : (tB, 2*D)   [weighted_mean | weighted_std]
    attw_ref : (tB, T)     attention weights (softmax over T)
    """
    tB, T, D = x_ref.shape
    A = w1_ref.shape[1]

    x = x_ref[...]                                           # read once, reused

    b1_eff = bw_ref[0:1, :]                                  # (1, A)
    w2_row = bw_ref[1:2, :]                                  # (1, A)

    # Attention MLP.  gcv is already folded into b1_eff; b2 is dropped
    # (softmax shift-invariance).  The reshape only collapses leading dims
    # (D stays innermost on lanes), so no lane relayout is introduced.
    h = jnp.tanh(
        jnp.dot(x.reshape(tB * T, D), w1_ref[...],
                preferred_element_type=jnp.float32) + b1_eff)          # (tB*T, A)
    scores = jnp.sum(h.reshape(tB, T, A) * w2_row, axis=-1)            # (tB, T)

    # Softmax over the time axis.  Exact division keeps the weights summing to
    # 1 at ~1e-6 (pl.reciprocal(approx=True) is an option if that slack is ok).
    m = jnp.max(scores, axis=-1, keepdims=True)
    e = jnp.exp(scores - m)
    w = e / jnp.sum(e, axis=-1, keepdims=True)                         # (tB, T)

    # One-pass weighted statistics over the time axis.
    w3 = w[:, :, None]                                                 # (tB, T, 1)
    wx = w3 * x
    mean = jnp.sum(wx, axis=1)                                         # (tB, D)
    meansq = jnp.sum(wx * x, axis=1)                                   # (tB, D)
    var = jnp.maximum(meansq - mean * mean, 0.0) + 1e-8
    std = jnp.sqrt(var)

    out_ref[...] = jnp.concatenate([mean, std], axis=-1)               # one store
    attw_ref[...] = w


# ----------------------------------------------------------------------------
# Wrapper (PyTorch-layout params in; folding / packing done here, once)
# ----------------------------------------------------------------------------
def attentive_stats_pooling(x, gcv, w1_pt, b1, w2_pt, b2=None, *, tile_b=None):
    """x: (B, T, D) -> (output (B, 2D), attention_weights (B, T)).

    w1_pt: (A, D)  PyTorch Linear weight (out, in)
    b1   : (A,)
    w2_pt: (1, A)
    b2   : unused (softmax shift-invariance) — kept for signature parity.
    """
    del b2
    B, T, D = x.shape
    A = w1_pt.shape[0]
    if tile_b is None:
        tile_b = B                  # whole batch per block at demo sizes
    assert B % tile_b == 0
    # For B > tile_b, tile_b should be a multiple of 8 (sublane tiling of the
    # 2-D outputs) and sized so tile_b*T fills the MXU M dim (>=128 v5e,
    # >=256 v6e/v7x) while the (tile_b*T, A) h intermediate stays in VMEM.

    w1_t = jnp.transpose(w1_pt)                              # (D, A)
    b1_eff = b1 + gcv @ w1_t                                 # fold gcv into bias
    bw = jnp.stack([b1_eff, w2_pt.reshape(A)], axis=0)       # packed (2, A)

    out, attw = pl.pallas_call(
        attentive_stats_pooling_kernel,
        out_shape=(jax.ShapeDtypeStruct((B, 2 * D), jnp.float32),
                   jax.ShapeDtypeStruct((B, T), jnp.float32)),
        grid=(B // tile_b,),
        in_specs=[pl.BlockSpec((tile_b, T, D), lambda b: (b, 0, 0)),
                  pl.BlockSpec((D, A), lambda b: (0, 0)),
                  pl.BlockSpec((2, A), lambda b: (0, 0))],
        out_specs=(pl.BlockSpec((tile_b, 2 * D), lambda b: (b, 0)),
                   pl.BlockSpec((tile_b, T), lambda b: (b, 0))),
        compiler_params=pltpu.CompilerParams(
            dimension_semantics=("parallel",)),
    )(x, w1_t, bw)
    return out, attw


# ----------------------------------------------------------------------------
# Pure-JAX reference (mirrors the PyTorch forward, lengths=None)
# ----------------------------------------------------------------------------
def reference_forward(x, gcv, w1_pt, b1, w2_pt, b2):
    ai = x + gcv[None, None, :]
    h = jnp.tanh(ai @ jnp.transpose(w1_pt) + b1)                       # (B, T, A)
    scores = jnp.squeeze(h @ jnp.transpose(w2_pt) + b2, axis=-1)       # (B, T)
    weights = jax.nn.softmax(scores, axis=1)
    mean = jnp.sum(weights[..., None] * x, axis=1)
    var = jnp.sum(weights[..., None] * (x - mean[:, None, :]) ** 2, axis=1)
    std = jnp.sqrt(var + 1e-8)
    return jnp.concatenate([mean, std], axis=-1), weights


# ----------------------------------------------------------------------------
# Main
# ----------------------------------------------------------------------------
if __name__ == "__main__":
    # batch=2, seq_len=8, input_dim=16, attention_dim=128, global_context=True
    # -> output (2, 32), attention weights (2, 8).
    B, T, D, A = 2, 8, 16, 128

    key = jax.random.PRNGKey(0)
    kx, kg, kw1, kb1, kw2, kb2 = jax.random.split(key, 6)

    x = jax.random.normal(kx, (B, T, D), jnp.float32)
    gcv = jax.random.normal(kg, (D,), jnp.float32)               # nn.Parameter(randn(D))
    w1_pt = jax.random.normal(kw1, (A, D), jnp.float32) / jnp.sqrt(D)
    b1 = 0.1 * jax.random.normal(kb1, (A,), jnp.float32)
    w2_pt = jax.random.normal(kw2, (1, A), jnp.float32) / jnp.sqrt(A)
    b2 = 0.1 * jax.random.normal(kb2, (1,), jnp.float32)

    fwd = jax.jit(attentive_stats_pooling)
    out, attw = fwd(x, gcv, w1_pt, b1, w2_pt, b2)
    out, attw = jax.block_until_ready((out, attw))

    assert out.shape == (B, 2 * D), out.shape
    assert attw.shape == (B, T), attw.shape
    assert out.dtype == jnp.float32 and attw.dtype == jnp.float32
    assert bool(jnp.all(jnp.isfinite(out)))
    assert bool(jnp.all(jnp.isfinite(attw)))

    ref_out, ref_w = reference_forward(x, gcv, w1_pt, b1, w2_pt, b2)
    assert jnp.allclose(out, ref_out, atol=1e-3, rtol=1e-3), (
        float(jnp.max(jnp.abs(out - ref_out))))
    assert jnp.allclose(attw, ref_w, atol=1e-3, rtol=1e-3), (
        float(jnp.max(jnp.abs(attw - ref_w))))
    # attention weights should sum to 1 per batch item
    assert jnp.allclose(jnp.sum(attw, axis=1), 1.0, atol=1e-5)

    print("KERNEL_OK")
</pallas_src>

<mosaic_0001>
module attributes {stable_mosaic.version = 11 : i64} {
  func.func @attentive_stats_pooling_kernel(%arg0: i32, %arg1: memref<2x8x16xf32, #tpu.memory_space<vmem>>, %arg2: memref<16x128xf32, #tpu.memory_space<vmem>>, %arg3: memref<2x128xf32, #tpu.memory_space<vmem>>, %arg4: memref<2x32xf32, #tpu.memory_space<vmem>>, %arg5: memref<2x8xf32, #tpu.memory_space<vmem>>) attributes {dimension_semantics = [#tpu.dimension_semantics<parallel>], iteration_bounds = array<i64: 1>, scalar_prefetch = 0 : i64, scratch_operands = 0 : i64, tpu.core_type = #tpu.core_type<tc>, window_params = [{transform_indices = @transform_0, window_bounds = array<i64: 2, 8, 16>}, {pipeline_mode = #tpu.pipeline_mode<synchronous>, transform_indices = @transform_1, window_bounds = array<i64: 16, 128>}, {pipeline_mode = #tpu.pipeline_mode<synchronous>, transform_indices = @transform_2, window_bounds = array<i64: 2, 128>}, {transform_indices = @transform_3, window_bounds = array<i64: 2, 32>}, {transform_indices = @transform_4, window_bounds = array<i64: 2, 8>}]} {
    %c0 = arith.constant 0 : index
    %c0_0 = arith.constant 0 : index
    %c0_1 = arith.constant 0 : index
    %0 = vector.load %arg1[%c0, %c0_0, %c0_1] : memref<2x8x16xf32, #tpu.memory_space<vmem>>, vector<2x8x16xf32>
    %c0_2 = arith.constant 0 : index
    %c0_3 = arith.constant 0 : index
    %1 = vector.load %arg3[%c0_2, %c0_3] : memref<2x128xf32, #tpu.memory_space<vmem>>, vector<1x128xf32>
    %c1 = arith.constant 1 : index
    %c0_4 = arith.constant 0 : index
    %2 = vector.load %arg3[%c1, %c0_4] : memref<2x128xf32, #tpu.memory_space<vmem>>, vector<1x128xf32>
    %3 = vector.shape_cast %0 : vector<2x8x16xf32> to vector<16x16xf32>
    %c0_5 = arith.constant 0 : index
    %c0_6 = arith.constant 0 : index
    %4 = vector.load %arg2[%c0_5, %c0_6] : memref<16x128xf32, #tpu.memory_space<vmem>>, vector<16x128xf32>
    %cst = arith.constant dense<0.000000e+00> : vector<16x128xf32>
    %5 = tpu.matmul %3, %4, %cst {dimension_numbers = #tpu.dot_dimension_numbers<[1], [0], [0], [1], [0, 0, 1, 1], [], []>} : vector<16x16xf32>, vector<16x128xf32>, vector<16x128xf32> -> vector<16x128xf32>
    %6 = vector.broadcast %1 : vector<1x128xf32> to vector<16x128xf32>
    %7 = arith.addf %5, %6 : vector<16x128xf32>
    %8 = math.tanh %7 : vector<16x128xf32>
    %9 = vector.shape_cast %8 : vector<16x128xf32> to vector<2x8x128xf32>
    %10 = vector.shape_cast %2 : vector<1x128xf32> to vector<1x1x128xf32>
    %11 = vector.broadcast %10 : vector<1x1x128xf32> to vector<2x8x128xf32>
    %12 = arith.mulf %9, %11 : vector<2x8x128xf32>
    %cst_7 = arith.constant dense<0.000000e+00> : vector<2x8xf32>
    %13 = vector.multi_reduction <add>, %12, %cst_7 [2] : vector<2x8x128xf32> to vector<2x8xf32>
    %cst_8 = arith.constant dense<0xFF800000> : vector<2xf32>
    %14 = vector.multi_reduction <maximumf>, %13, %cst_8 [1] : vector<2x8xf32> to vector<2xf32>
    %15 = vector.shape_cast %14 : vector<2xf32> to vector<2x1xf32>
    %16 = vector.broadcast %15 : vector<2x1xf32> to vector<2x8xf32>
    %17 = arith.subf %13, %16 : vector<2x8xf32>
    %18 = math.exp %17 : vector<2x8xf32>
    %cst_9 = arith.constant dense<0.000000e+00> : vector<2xf32>
    %19 = vector.multi_reduction <add>, %18, %cst_9 [1] : vector<2x8xf32> to vector<2xf32>
    %20 = vector.shape_cast %19 : vector<2xf32> to vector<2x1xf32>
    %21 = vector.broadcast %20 : vector<2x1xf32> to vector<2x8xf32>
    %22 = arith.divf %18, %21 : vector<2x8xf32>
    %23 = vector.shape_cast %22 : vector<2x8xf32> to vector<2x8x1xf32>
    %24 = vector.broadcast %23 : vector<2x8x1xf32> to vector<2x8x16xf32>
    %25 = arith.mulf %24, %0 : vector<2x8x16xf32>
    %cst_10 = arith.constant dense<0.000000e+00> : vector<2x16xf32>
    %26 = vector.multi_reduction <add>, %25, %cst_10 [1] : vector<2x8x16xf32> to vector<2x16xf32>
    %27 = arith.mulf %25, %0 : vector<2x8x16xf32>
    %cst_11 = arith.constant dense<0.000000e+00> : vector<2x16xf32>
    %28 = vector.multi_reduction <add>, %27, %cst_11 [1] : vector<2x8x16xf32> to vector<2x16xf32>
    %29 = arith.mulf %26, %26 : vector<2x16xf32>
    %30 = arith.subf %28, %29 : vector<2x16xf32>
    %cst_12 = arith.constant 0.000000e+00 : f32
    %31 = vector.broadcast %cst_12 : f32 to vector<2x16xf32>
    %32 = arith.maximumf %30, %31 : vector<2x16xf32>
    %cst_13 = arith.constant 9.99999993E-9 : f32
    %33 = vector.broadcast %cst_13 : f32 to vector<2x16xf32>
    %34 = arith.addf %32, %33 : vector<2x16xf32>
    %35 = math.sqrt %34 : vector<2x16xf32>
    %36 = tpu.concatenate %26, %35 in 1 : vector<2x16xf32>, vector<2x16xf32> -> vector<2x32xf32>
    %c0_14 = arith.constant 0 : index
    %c0_15 = arith.constant 0 : index
    %37 = vector.load %arg4[%c0_14, %c0_15] : memref<2x32xf32, #tpu.memory_space<vmem>>, vector<2x32xf32>
    tpu.vector_store %arg4[%c0_14, %c0_15], %36 {strides = array<i32>} : memref<2x32xf32, #tpu.memory_space<vmem>>, vector<2x32xf32>,
    %c0_16 = arith.constant 0 : index
    %c0_17 = arith.constant 0 : index
    %38 = vector.load %arg5[%c0_16, %c0_17] : memref<2x8xf32, #tpu.memory_space<vmem>>, vector<2x8xf32>
    tpu.vector_store %arg5[%c0_16, %c0_17], %22 {strides = array<i32>} : memref<2x8xf32, #tpu.memory_space<vmem>>, vector<2x8xf32>,
    return
  }
  func.func @transform_0(%arg0: i32) -> (i32, i32, i32) {
    %c0_i32 = arith.constant 0 : i32
    %c0_i32_0 = arith.constant 0 : i32
    %c0_i32_1 = arith.constant 0 : i32
    return %arg0, %c0_i32, %c0_i32_0 : i32, i32, i32
  }
  func.func @transform_1(%arg0: i32) -> (i32, i32) {
    %c0_i32 = arith.constant 0 : i32
    %c0_i32_0 = arith.constant 0 : i32
    %c0_i32_1 = arith.constant 0 : i32
    return %c0_i32, %c0_i32_0 : i32, i32
  }
  func.func @transform_2(%arg0: i32) -> (i32, i32) {
    %c0_i32 = arith.constant 0 : i32
    %c0_i32_0 = arith.constant 0 : i32
    %c0_i32_1 = arith.constant 0 : i32
    return %c0_i32, %c0_i32_0 : i32, i32
  }
  func.func @transform_3(%arg0: i32) -> (i32, i32) {
    %c0_i32 = arith.constant 0 : i32
    %c0_i32_0 = arith.constant 0 : i32
    return %arg0, %c0_i32 : i32, i32
  }
  func.func @transform_4(%arg0: i32) -> (i32, i32) {
    %c0_i32 = arith.constant 0 : i32
    %c0_i32_0 = arith.constant 0 : i32
    return %arg0, %c0_i32 : i32, i32
  }
}

</mosaic_0001>

<bundles_post_ra>
// kernel: attentive_stats_pooling.1
= control target key start
LH: loop header
LB: loop body
LE: loop exit
PB: predicated region body
PF: predicated region fallthrough
CT: control target
= control target key end

     0   :  { %10 = vsyncpa [#allocation3], 0  ;;  %s475_s0 = inlined_call_operand.hbm [shape: f32[2,8,16], index: 0, kind: input, shape index: {}]   ;;  %s476_s1 = inlined_call_operand.vmem [shape: f32[16,128], index: 1, kind: input, shape index: {}]   ;;  %s477_s2 = inlined_call_operand.vmem [shape: f32[2,128], index: 2, kind: input, shape index: {}]   ;;  %s478_s3 = inlined_call_operand.hbm [shape: f32[2,32], index: 3, kind: output, shape index: {0}]   ;;  %s479_s4 = inlined_call_operand.hbm [shape: f32[2,8], index: 4, kind: output, shape index: {1}]  }
   0x1   :  { %11 = vsyncpa [#allocation4], 0 }
   0x2   :  { %12 = vsyncpa [#allocation7], 0  ;;  %s17_s17 = sshll.u32 %s475_s0, 4  ;;  %s389_s18 = smov [#allocation2]   ;;  %s18_s17 = int_to_ptr.hbm [resolvable:$true] %s17_s17 }
   0x3   :  { %s19_s19 = sshll.u32 %s389_s18, 4  ;;  %s390_s20 = smov 128   ;;  %s20_s19 = int_to_ptr.vmem [resolvable:$true] %s19_s19 }
   0x4   :  { %s391_s21 = smov 8  }
   0x5   :  { %25 = dma.hbm_to_vmem [thread:$0]  %s18_s17, 256, %s20_s19, [#allocation3], %s390_s20, %s390_s20, %s391_s21  }
   0x6   :  { %383 = dma.done.wait [#allocation3], 256  }
   0x7   :  { %384 = vsyncadd [#allocation3], 4294967040  ;;  %v39_v0 = vld [vmem:[%s476_s1 + $0x8] sm:$0xff]  ;;  %v38_v1 = vld [vmem:[%s476_s1] sm:$0xff]  ;;  %vm41_vm0 = vcmask 130048   ;;  %v82_v15 = vlaneseq  ;;  %vm86_vm1 = vcmask 1041409  }
   0x8   :  { %62 = vmatpush.msra.mxu0 %v39_v0  ;;  %v430_v2 = vld [vmem:[#allocation2] sm:$0xff]  ;;  %281 = vmatpush.msra.mxu1 %v39_v0  ;;  %v432_v3 = vld [vmem:[#allocation2 + $0x8] sm:$0xff]  ;;  %vm89_vm2 = vcmask 58368   ;;  %v392_v22 = vmov 0   ;;  %s264_s5 = sshll.u32 %s479_s4, 4  ;;  %s394_s4 = smov 16   ;;  %s265_s5 = int_to_ptr.hbm [resolvable:$true] %s264_s5 }
   0x9   :  { %v293_v4 = vld [vmem:[%s477_s2] ss:$0 sm:$0xff]  ;;  %v294_v9 = vld [vmem:[%s477_s2 + $0x1] ss:$0 sm:$0xff]  ;;  %v444_v16 = vand.u32 127, %v82_v15  ;;  %291 = vset.pattern.permute.xlu2 %v392_v22  ;;  %290 = vset.pattern.permute.xlu1 %v392_v22  ;;  %s393_s2 = smov [#allocation6]  }
   0xa   :  { %63 = vmatpush.msra.mxu0 %v38_v1  ;;  %282 = vmatpush.msra.mxu1 %v38_v1  ;;  %s262_s28 = sshll.u32 %s393_s2, 4  ;;  %s395_s6 = smov [#allocation5]   ;;  %vm239_vm15 = vcmask 254976   ;;  %s263_s28 = int_to_ptr.vmem [resolvable:$true] %s262_s28 }
   0xb   :  { %279 = vmatmul.msk.f32.vlgmr.msra.gmra.mxu0 %vm41_vm0, %v430_v2  ;;  %280 = vmatmul.msk.f32.vlgmr.msra.gmra.mxu1 %vm41_vm0, %v432_v3  ;;  %s251_s7 = sshll.u32 %s395_s6, 4  ;;  %s253_s10 = sshll.u32 %s478_s3, 4  ;;  %s252_s7 = int_to_ptr.vmem [resolvable:$true] %s251_s7  ;;  %s254_s10 = int_to_ptr.hbm [resolvable:$true] %s253_s10 }
   0xc   :  { %292 = vset.pattern.permute.xlu0 %v392_v22 }
  0x88   :  { %v65_v5 = vpop.f32.mrf.mxu0  ;;  %v68_v6 = vpop.f32.mrf.mxu1 }
  0x89   :  { %v66_v7 = vadd.f32 %v293_v4, %v65_v5  ;;  %v69_v8 = vadd.f32 %v293_v4, %v68_v6 }
  0x8b   :  { %295 = vtanh.f32 %v66_v7 }
  0x8c   :  { %297 = vtanh.f32 %v69_v8 }
  0x91   :  { %v296_v10 = vpop.eup %295 }
  0x92   :  { %v74_v11 = vmul.f32 %v296_v10, %v294_v9  ;;  %v298_v12 = vpop.eup %297 }
  0x93   :  { %v75_v13 = vmul.f32 %v298_v12, %v294_v9 }
  0x94   :  { %76 = vadd.xlane.f32.xlu0 %v74_v11 }
  0x9c   :  { %78 = vadd.xlane.f32.xlu0 %v75_v13 }
 0x107   :  { %v77_v14 = vpop.xlane.xlu0 %76 }
 0x108   :  { %v84_v18 = vperm.slane %v77_v14, %v444_v16 }
 0x10f   :  { %v79_v17 = vpop.xlane.xlu0 %78 }
 0x110   :  { %v85_v19 = vperm.slane %v79_v17, %v444_v16 }
 0x112   :  { %v87_v20 = vsel %vm86_vm1, %v85_v19, %v84_v18 }
 0x113   :  { %v90_v21 = vsel %vm89_vm2, %v87_v20, -inf }
 0x114   :  { %91 = vmax.xlane.f32.xlu1 %v90_v21 }
 0x187   :  { %v92_v23 = vpop.xlane.xlu1 %91 }
 0x188   :  { %v94_v24 = vperm.slane %v92_v23, 0  ;;  %v95_v25 = vperm.slane %v92_v23, 1 }
 0x18a   :  { %v98_v26 = vsub.f32 %v77_v14, %v94_v24  ;;  %v99_v27 = vsub.f32 %v79_v17, %v95_v25 }
 0x18c   :  { %v100_v28 = vmul.f32 1.442695, %v98_v26  ;;  %v102_v29 = vmul.f32 1.442695, %v99_v27 }
 0x18e   :  { %299 = vpow2.f32 %v100_v28 }
 0x18f   :  { %301 = vpow2.f32 %v102_v29 }
 0x194   :  { %v300_v30 = vpop.eup %299 }
 0x195   :  { %v302_v31 = vpop.eup %301  ;;  %107 = vperm.xlu1 %290, %v300_v30  }
 0x196   :  { %110 = vperm.xlu2 %291, %v302_v31  }
 0x1f0   :  { %v111_v32 = vpop.permute.xlu2 %110 }
 0x1f1   :  { %v113_v34 = vperm.slane %v111_v32, %v444_v16 }
 0x207   :  { %v108_v33 = vpop.permute.xlu1 %107 }
 0x208   :  { %v112_v35 = vperm.slane %v108_v33, %v444_v16 }
 0x20a   :  { %v114_v36 = vsel %vm86_vm1, %v113_v34, %v112_v35 }
 0x20b   :  { %v116_v37 = vsel %vm89_vm2, %v114_v36, 0.0 }
 0x20c   :  { %117 = vadd.xlane.f32.xlu2 %v116_v37 }
 0x27f   :  { %v118_v38 = vpop.xlane.xlu2 %117 }
 0x280   :  { %v120_v39 = vperm.slane %v118_v38, 0  ;;  %v121_v40 = vperm.slane %v118_v38, 1 }
 0x282   :  { %303 = vrcp.f32 %v120_v39  ;;  %v135_v47 = vand.u32 2147483648, %v120_v39  ;;  %v150_v48 = vand.u32 2147483648, %v121_v40  ;;  %v133_v50 = vand.u32 2147483647, %v120_v39 }
 0x283   :  { %305 = vrcp.f32 %v121_v40  ;;  %v148_v52 = vand.u32 2147483647, %v121_v40  ;;  %vm129_vm5 = vweird.f32 %v120_v39  ;;  %vm144_vm6 = vweird.f32 %v121_v40 }
 0x284   :  { %v136_v55 = vor.u32 1.1754944e-38, %v135_v47  ;;  %v151_v56 = vor.u32 1.1754944e-38, %v150_v48  ;;  %vm134_vm9 = vcmp.eq.f32.partialorder %v133_v50, 8.507059e+37 }
 0x285   :  { %vm149_vm10 = vcmp.eq.f32.partialorder %v148_v52, 8.507059e+37 }
 0x288   :  { %v304_v41 = vpop.eup %303 }
 0x289   :  { %v306_v42 = vpop.eup %305  ;;  %v125_v43 = vmul.f32 %v304_v41, %v120_v39  ;;  %vm130_vm3 = vweird.f32 %v304_v41 }
 0x28a   :  { %v140_v44 = vmul.f32 %v306_v42, %v121_v40  ;;  %vm145_vm4 = vweird.f32 %v306_v42  ;;  %vm131_vm7 = vmor %vm129_vm5, %vm130_vm3 }
 0x28b   :  { %v126_v45 = vsub.f32 1.0, %v125_v43  ;;  %vm146_vm8 = vmor %vm144_vm6, %vm145_vm4 }
 0x28c   :  { %v141_v46 = vsub.f32 1.0, %v140_v44 }
 0x28d   :  { %v127_v49 = vmul.f32 %v304_v41, %v126_v45 }
 0x28e   :  { %v142_v51 = vmul.f32 %v306_v42, %v141_v46 }
 0x28f   :  { %v128_v53 = vadd.f32 %v304_v41, %v127_v49 }
 0x290   :  { %v143_v54 = vadd.f32 %v306_v42, %v142_v51 }
 0x291   :  { %v132_v57 = vsel %vm131_vm7, %v304_v41, %v128_v53 }
 0x292   :  { %v147_v58 = vsel %vm146_vm8, %v306_v42, %v143_v54  ;;  %v137_v59 = vsel %vm134_vm9, %v136_v55, %v132_v57 }
 0x293   :  { %v152_v60 = vsel %vm149_vm10, %v151_v56, %v147_v58  ;;  %v138_v61 = vmul.f32 %v300_v30, %v137_v59 }
 0x294   :  { %v153_v62 = vmul.f32 %v302_v31, %v152_v60 }
 0x295   :  { %156 = vperm.xlu0 %292, %v138_v61  }
 0x296   :  { %161 = vperm.xlu1 %290, %v153_v62  }
 0x307   :  { %v157_v63 = vpop.permute.xlu0 %156 }
 0x308   :  { %v162_v0 = vpop.permute.xlu1 %161  ;;  %v164_v1 = vmul.f32 %v157_v63, %v430_v2  ;;  %v241_v4 = vperm.slane %v157_v63, %v444_v16 }
 0x309   :  { %v165_v5 = vmul.f32 %v162_v0, %v432_v3  ;;  %v242_v6 = vperm.slane %v162_v0, %v444_v16 }
 0x30a   :  { %v166_v7 = vsel %vm41_vm0, %v164_v1, 0.0  ;;  %v180_v8 = vmul.f32 %v164_v1, %v430_v2 }
 0x30b   :  { %v173_v9 = vsel %vm41_vm0, %v165_v5, 0.0  ;;  %v181_v10 = vmul.f32 %v165_v5, %v432_v3  ;;  %v167_v11 = vrot.slane %v166_v7, 4  ;;  %v243_v12 = vsel %vm86_vm1, %v242_v6, %v241_v4 }
 0x30c   :  { %v174_v13 = vrot.slane %v173_v9, 4  ;;  %v182_v14 = vsel %vm41_vm0, %v180_v8, 0.0  ;;  %245 = vst.msk [vmem:[#allocation6] sm:$0x3] %vm89_vm2, %v243_v12 }
 0x30d   :  { %v189_v15 = vsel %vm41_vm0, %v181_v10, 0.0  ;;  %v168_v17 = vadd.f32 %v167_v11, %v166_v7  ;;  %v183_v16 = vrot.slane %v182_v14, 4  ;;  %267 = dma.vmem_to_hbm [thread:$0]  %s263_s28, 32, %s265_s5, [#allocation7]  }
 0x30e   :  { %v175_v18 = vadd.f32 %v174_v13, %v173_v9  ;;  %v190_v19 = vrot.slane %v189_v15, 4 }
 0x30f   :  { %v169_v20 = vrot.slane %v168_v17, 2  ;;  %v184_v2 = vadd.f32 %v183_v16, %v182_v14 }
 0x310   :  { %v176_v21 = vrot.slane %v175_v18, 2  ;;  %v191_v22 = vadd.f32 %v190_v19, %v189_v15 }
 0x311   :  { %v170_v23 = vadd.f32 %v169_v20, %v168_v17  ;;  %v185_v3 = vrot.slane %v184_v2, 2 }
 0x312   :  { %v177_v24 = vadd.f32 %v176_v21, %v175_v18  ;;  %v192_v25 = vrot.slane %v191_v22, 2 }
 0x313   :  { %v171_v26 = vrot.slane %v170_v23, 1  ;;  %v186_v27 = vadd.f32 %v185_v3, %v184_v2 }
 0x314   :  { %v178_v28 = vrot.slane %v177_v24, 1  ;;  %v193_v29 = vadd.f32 %v192_v25, %v191_v22 }
 0x315   :  { %v172_v30 = vadd.f32 %v171_v26, %v170_v23  ;;  %v187_v31 = vrot.slane %v186_v27, 1 }
 0x316   :  { %v179_v32 = vadd.f32 %v178_v28, %v177_v24  ;;  %v194_v33 = vrot.slane %v193_v29, 1 }
 0x317   :  { %v188_v34 = vadd.f32 %v187_v31, %v186_v27  ;;  %v196_v35 = vmul.f32 %v172_v30, %v172_v30 }
 0x318   :  { %v195_v36 = vadd.f32 %v194_v33, %v193_v29  ;;  %v197_v37 = vmul.f32 %v179_v32, %v179_v32  ;;  %v230_v38 = vsel %vm86_vm1, %v179_v32, %v172_v30 }
 0x319   :  { %v198_v39 = vsub.f32 %v188_v34, %v196_v35 }
 0x31a   :  { %v199_v40 = vsub.f32 %v195_v36, %v197_v37 }
 0x31b   :  { %v200_v41 = vmax.f32 %v198_v39, 0.0 }
 0x31c   :  { %v201_v42 = vmax.f32 %v199_v40, 0.0 }
 0x31d   :  { %v202_v43 = vadd.f32 1e-08, %v200_v41 }
 0x31e   :  { %v203_v44 = vadd.f32 1e-08, %v201_v42 }
 0x31f   :  { %307 = vrsqrt.f32 %v202_v43  ;;  %vm211_vm11 = vcmp.eq.f32.partialorder %v202_v43, inf  ;;  %v214_v58 = vand.u32 2147483648, %v202_v43  ;;  %vm213_vm12 = vcmp.eq.f32.partialorder %v202_v43, 0.0 }
 0x320   :  { %309 = vrsqrt.f32 %v203_v44  ;;  %vm223_vm13 = vcmp.eq.f32.partialorder %v203_v44, inf  ;;  %v226_v61 = vand.u32 2147483648, %v203_v44  ;;  %vm225_vm14 = vcmp.eq.f32.partialorder %v203_v44, 0.0 }
 0x325   :  { %v308_v45 = vpop.eup %307 }
 0x326   :  { %v310_v46 = vpop.eup %309  ;;  %v205_v47 = vmul.f32 %v308_v45, %v202_v43 }
 0x327   :  { %v217_v48 = vmul.f32 %v310_v46, %v203_v44 }
 0x328   :  { %v206_v49 = vmul.f32 %v308_v45, %v205_v47 }
 0x329   :  { %v218_v50 = vmul.f32 %v310_v46, %v217_v48 }
 0x32a   :  { %v207_v51 = vmul.f32 0.5, %v206_v49 }
 0x32b   :  { %v219_v52 = vmul.f32 0.5, %v218_v50 }
 0x32c   :  { %v208_v53 = vsub.f32 1.5, %v207_v51 }
 0x32d   :  { %v220_v54 = vsub.f32 1.5, %v219_v52 }
 0x32e   :  { %v209_v55 = vmul.f32 %v308_v45, %v208_v53 }
 0x32f   :  { %v221_v56 = vmul.f32 %v310_v46, %v220_v54 }
 0x330   :  { %v210_v57 = vmul.f32 %v209_v55, %v202_v43 }
 0x331   :  { %v222_v59 = vmul.f32 %v221_v56, %v203_v44 }
 0x332   :  { %v212_v60 = vsel %vm211_vm11, %v202_v43, %v210_v57 }
 0x333   :  { %v215_v62 = vsel %vm213_vm12, %v214_v58, %v212_v60  ;;  %v224_v63 = vsel %vm223_vm13, %v203_v44, %v222_v59 }
 0x334   :  { %v227_v0 = vsel %vm225_vm14, %v226_v61, %v224_v63 }
 0x335   :  { %v234_v1 = vsel %vm86_vm1, %v227_v0, %v215_v62 }
 0x336   :  { %235 = vrot.lane.b32.xlu1 %v234_v1, %s394_s4 }
 0x3a8   :  { %v236_v4 = vpop.permute.xlu1 %235 }
 0x3a9   :  { %v238_v5 = vsel %vm41_vm0, %v230_v38, %v236_v4 }
 0x3aa   :  { %240 = vst.msk [vmem:[#allocation5] sm:$0x3] %vm239_vm15, %v238_v5 }
 0x3ab   :  { %256 = dma.vmem_to_hbm [thread:$0]  %s252_s7, 32, %s254_s10, [#allocation4]  }
 0x3ac   :  { %385 = dma.done.wait [#allocation4], 32  }
 0x3ad   :  { %386 = vsyncadd [#allocation4], 4294967264 }
 0x3ae   :  { %387 = dma.done.wait [#allocation7], 32  }
 0x3af   :  { %388 = vsyncadd [#allocation7], 4294967264 }
 0x3b0   :  { %276 = vsyncpa [#allocation3], 1 }
 0x3b1   :  { %277 = vsyncpa [#allocation4], 1 }
 0x3b2   :  { %278 = vsyncpa [#allocation7], 1 }

</bundles_post_ra>
